<compile_context>
chip_gen: v7x
topology: tpu7x:2x2x1
jax: 0.10.0
libtpu: 0.0.40
codegen_flags: <defaults>
</compile_context>

<pallas_src>
import functools

import jax
import jax.numpy as jnp
from jax.experimental import pallas as pl
from jax.experimental.pallas import tpu as pltpu


# ----------------------------------------------------------------------------
# Fused single-pass kernel: one batch element per grid step, manual streaming.
#   x/out are HBM refs; a single VMEM slab (n_chunks, C, cs) holds the batch's
#   (C, S) volume.  Input chunk DMAs overlap pooling; output chunk DMAs
#   overlap the broadcast multiply.
# ----------------------------------------------------------------------------
def _fused_kernel(x_hbm, wfct_ref, bfc_ref, w1t_ref, b1_ref, w2_ref, b2_ref,
                  o_hbm, slab, in_sems, out_sems, *, n_chunks, cs, inv_s):
    b = pl.program_id(0)
    C = slab.shape[1]

    # Issue every input-chunk DMA up front; they complete while we pool.
    in_copies = []
    for k in range(n_chunks):
        cp = pltpu.make_async_copy(
            x_hbm.at[b, :, pl.ds(k * cs, cs)], slab.at[k], in_sems.at[k])
        cp.start()
        in_copies.append(cp)

    # AdaptiveAvgPool3d(1): f32-accumulated mean over the lane (spatial) axis,
    # overlapped with the in-flight chunk DMAs.
    psum = jnp.zeros((C, 1), jnp.float32)
    for k in range(n_chunks):
        in_copies[k].wait()
        psum = psum + jnp.sum(slab[k].astype(jnp.float32), axis=1, keepdims=True)
    pooled = psum * inv_s                                              # (C, 1)

    # Domain softmax + SE mixing.  All tiny (n, C, Cr) math is VPU multiply +
    # XLU reduce in "column space" -- no M=1 MXU matvecs on the critical path.
    logits = jnp.sum(wfct_ref[...] * pooled, axis=0, keepdims=True) + bfc_ref[...]  # (1, n)
    logits = logits - jnp.max(logits, axis=1, keepdims=True)
    e = jnp.exp(logits)
    weight = e / jnp.sum(e, axis=1, keepdims=True)                     # (1, n)

    acc = jnp.zeros((C, 1), jnp.float32)
    for i in range(w1t_ref.shape[0]):                                  # static unroll (n=2)
        h = jnp.sum(w1t_ref[i] * pooled, axis=0, keepdims=True) + b1_ref[i]   # (1, Cr)
        h = jnp.maximum(h, 0.0)
        se = jnp.sum(w2_ref[i] * h, axis=1, keepdims=True) + b2_ref[i]        # (C, 1)
        acc = acc + se * weight[0:1, i:i + 1]

    # Cast BEFORE the big multiply so the (C, S) product stays in x's dtype.
    scale = jax.nn.sigmoid(acc).astype(slab.dtype)                     # (C, 1)

    # Broadcast multiply + write back; chunk k's DMA-out overlaps chunk k+1's
    # multiply.
    out_copies = []
    for k in range(n_chunks):
        slab[k] = slab[k] * scale
        cp = pltpu.make_async_copy(
            slab.at[k], o_hbm.at[b, :, pl.ds(k * cs, cs)], out_sems.at[k])
        cp.start()
        out_copies.append(cp)
    for k in range(n_chunks):
        out_copies[k].wait()


# ----------------------------------------------------------------------------
# Tiled fallback: lane-dense broadcast multiply, grid = (B, S // tS).
# (scale is pre-cast to x.dtype in the wrapper, so the multiply is native.)
# ----------------------------------------------------------------------------
def _apply_scale_kernel(scale_ref, x_ref, o_ref):
    o_ref[0] = (x_ref[0] * scale_ref[0]).astype(o_ref.dtype)          # (C, tS)*(C, 1)


# ----------------------------------------------------------------------------
# Hardware heuristics.
# ----------------------------------------------------------------------------
def _vmem_capacity_bytes():
    try:
        return int(pltpu.get_tpu_info().vmem_capacity_bytes)
    except Exception:
        return 64 * 1024 * 1024   # conservative (v7x per-core VMEM)


def _num_tensorcores():
    """Best-effort TensorCores-per-chip query (1 on v5e/v6e, 2 on v7x)."""
    try:
        info = pltpu.get_tpu_info()
        for attr in ("num_tensorcores", "tensorcore_count", "num_cores", "core_count"):
            v = getattr(info, attr, None)
            if isinstance(v, int) and v > 0:
                return v
    except Exception:
        pass
    try:
        d = jax.devices()[0]
        kind = (getattr(d, "device_kind", "") or "").lower()
        if "v7" in kind:
            return 2
        v = getattr(d, "num_cores", None)
        if isinstance(v, int) and v > 0:
            return v
    except Exception:
        pass
    return 1


def _pick_chunks(S, C, itemsize):
    """Chunking of the S axis for the fused streaming kernel."""
    # Prefer more chunks (better DMA/compute overlap) as long as each chunk is
    # a DMA-friendly >= 64 KiB and a multiple of 128 lanes.
    for nc in (8, 4, 2):
        if S % nc == 0 and (S // nc) % 128 == 0 and (S // nc) * C * itemsize >= (64 << 10):
            return nc, S // nc
    if S % 2 == 0 and (S // 2) % 128 == 0:
        return 2, S // 2
    return 1, S


def _pick_tile_s(S, C, itemsize, cap, min_tiles=1):
    """S-tile for the tiled path: big (roofline-friendly) but VMEM-safe."""
    budget = max(4 << 20, cap // 8)            # scales with generation's VMEM
    max_ts = max(128, budget // (4 * C * itemsize))
    ts = min(S, max_ts)
    if min_tiles > 1:                          # make sure every core gets work
        ts = min(ts, max(128, S // min_tiles))
    if ts < S:                                 # multiple of 128 unless full
        g = 512 if ts >= 512 else 128          # 512+ lanes ~ 85% HBM roofline
        ts = max(128, (ts // g) * g)
    return int(ts)


# ----------------------------------------------------------------------------
# Public wrapper.
# ----------------------------------------------------------------------------
def domain_attention(x_ncdhw, params, *, path="auto", tile_s=None):
    """x_ncdhw: (B, C, D, H, W); params in PyTorch-native nn.Linear layouts."""
    w1, b1, w2, b2, wfc, bfc = params
    B, C, D, H, W = x_ncdhw.shape
    S = D * H * W
    n = wfc.shape[0]
    Cr = w1.shape[1]
    itemsize = x_ncdhw.dtype.itemsize

    # Free reshape: NCDHW -> (B, C, S). No transposes anywhere; S is lane-dense.
    x = x_ncdhw.reshape(B, C, S)

    cap = _vmem_capacity_bytes()
    cores = _num_tensorcores()

    nc, cs = _pick_chunks(S, C, itemsize)
    slab_bytes = C * S * itemsize
    # One resident slab + one f32 chunk temp + params/slack (no double-buffered
    # in/out slabs any more -> much looser fused admission, esp. on v7x/v6e).
    est_vmem = slab_bytes + C * cs * 4 + (2 << 20)
    prefer_tiled_for_cores = (B == 1 and cores >= 2)   # feed both v7x cores
    use_fused = (path == "fused") or (
        path == "auto" and est_vmem <= int(0.7 * cap) and not prefer_tiled_for_cores)

    if use_fused:
        # Param layouts chosen so all per-batch math is broadcast-mult + reduce
        # in (C, 1) column space (VPU/XLU only, no in-kernel transposes).
        wfc_t = wfc.T                              # (C, n)
        bfc_row = bfc.reshape(1, n)
        w1_t = jnp.transpose(w1, (0, 2, 1))        # (n, C, Cr)
        b1_row = b1.reshape(n, 1, Cr)
        b2_col = b2.reshape(n, C, 1)               # w2 stays native (n, C, Cr)

        vmem_limit = min(int(0.95 * cap), est_vmem + (8 << 20))
        kern = functools.partial(_fused_kernel, n_chunks=nc, cs=cs, inv_s=1.0 / S)
        y = pl.pallas_call(
            kern,
            out_shape=jax.ShapeDtypeStruct((B, C, S), x.dtype),
            grid_spec=pltpu.PrefetchScalarGridSpec(
                num_scalar_prefetch=0,
                grid=(B,),
                in_specs=[
                    pl.BlockSpec(memory_space=pl.ANY),                # x stays in HBM
                    pl.BlockSpec((C, n), lambda b: (0, 0)),           # fc_1 weight^T
                    pl.BlockSpec((1, n), lambda b: (0, 0)),           # fc_1 bias
                    pl.BlockSpec((n, C, Cr), lambda b: (0, 0, 0)),    # SE fc1 weights^T
                    pl.BlockSpec((n, 1, Cr), lambda b: (0, 0, 0)),    # SE fc1 biases
                    pl.BlockSpec((n, C, Cr), lambda b: (0, 0, 0)),    # SE fc2 weights
                    pl.BlockSpec((n, C, 1), lambda b: (0, 0, 0)),     # SE fc2 biases
                ],
                out_specs=pl.BlockSpec(memory_space=pl.ANY),          # y stays in HBM
                scratch_shapes=[
                    pltpu.VMEM((nc, C, cs), x.dtype),                 # single slab
                    pltpu.SemaphoreType.DMA((nc,)),                   # input chunk sems
                    pltpu.SemaphoreType.DMA((nc,)),                   # output chunk sems
                ],
            ),
            compiler_params=pltpu.CompilerParams(
                dimension_semantics=("parallel",),
                vmem_limit_bytes=int(vmem_limit),
            ),
            cost_estimate=pl.CostEstimate(
                flops=2 * B * C * S,
                transcendentals=B * (C + 4 * n),
                bytes_accessed=2 * B * C * S * itemsize),
        )(x, wfc_t, bfc_row, w1_t, b1_row, w2, b2_col)
    else:
        # Pass 1 (tiny, all batches at once, XLA): pooled -> softmax -> SE mix.
        pooled = jnp.mean(x, axis=-1, dtype=jnp.float32)              # (B, C)
        weight = jax.nn.softmax(pooled @ wfc.T + bfc, axis=-1)        # (B, n)
        acc = jnp.zeros_like(pooled)
        for i in range(n):
            h = jnp.maximum(pooled @ w1[i].T + b1[i], 0.0)            # (B, Cr)
            se = h @ w2[i].T + b2[i]                                  # (B, C)
            acc = acc + se * weight[:, i:i + 1]
        # Pre-cast so the big multiply runs in the input dtype.
        scale = jax.nn.sigmoid(acc).astype(x.dtype)[..., None]        # (B, C, 1)

        min_tiles = 2 if (B == 1 and cores >= 2) else 1
        ts = int(tile_s) if tile_s is not None else _pick_tile_s(S, C, itemsize, cap, min_tiles)
        n_s = pl.cdiv(S, ts)
        tile_bytes = C * ts * itemsize
        vmem_limit = min(int(0.9 * cap), 4 * tile_bytes + (8 << 20))
        y = pl.pallas_call(
            _apply_scale_kernel,
            out_shape=jax.ShapeDtypeStruct((B, C, S), x.dtype),
            grid_spec=pltpu.PrefetchScalarGridSpec(
                num_scalar_prefetch=0,
                grid=(B, n_s),
                in_specs=[
                    pl.BlockSpec((1, C, 1), lambda b, s: (b, 0, 0)),   # scale
                    pl.BlockSpec((1, C, ts), lambda b, s: (b, 0, s)),  # x tile
                ],
                out_specs=pl.BlockSpec((1, C, ts), lambda b, s: (b, 0, s)),
            ),
            compiler_params=pltpu.CompilerParams(
                dimension_semantics=("parallel", "parallel"),
                vmem_limit_bytes=int(vmem_limit)),
            cost_estimate=pl.CostEstimate(
                flops=B * C * S,
                transcendentals=0,
                bytes_accessed=2 * B * C * S * itemsize + B * C * itemsize),
        )(scale, x)

    return y.reshape(B, C, D, H, W)


def domain_attention_reference(x, params):
    """Pure-JAX reference mirroring the PyTorch forward (non-fixed_block path)."""
    w1, b1, w2, b2, wfc, bfc = params
    pooled = jnp.mean(x, axis=(2, 3, 4))                              # (B, C)
    weight = jax.nn.softmax(pooled @ wfc.T + bfc, axis=1)             # (B, n)
    ses = []
    for i in range(w1.shape[0]):
        h = jnp.maximum(pooled @ w1[i].T + b1[i], 0.0)                # (B, Cr)
        ses.append(h @ w2[i].T + b2[i])                               # (B, C)
    se_matrix = jnp.stack(ses, axis=2)                                # (B, C, n)
    scale = jax.nn.sigmoid(jnp.einsum('bcn,bn->bc', se_matrix, weight))
    return x * scale[:, :, None, None, None]


if __name__ == "__main__":
    planes, reduction, n_adapters = 32, 16, 2   # cfg['num_adapters']=2, fixed_block=False
    Cr = planes // reduction
    B, D, H, W = 2, 4, 16, 16                    # S = 1024 (lane-dense)

    key = jax.random.PRNGKey(0)
    ks = jax.random.split(key, 7)
    x = jax.random.normal(ks[0], (B, planes, D, H, W), jnp.float32)

    # Parameters in PyTorch-native nn.Linear layout: weight = (out, in).
    w1 = 0.2 * jax.random.normal(ks[1], (n_adapters, Cr, planes), jnp.float32)
    b1 = 0.1 * jax.random.normal(ks[2], (n_adapters, Cr), jnp.float32)
    w2 = 0.2 * jax.random.normal(ks[3], (n_adapters, planes, Cr), jnp.float32)
    b2 = 0.1 * jax.random.normal(ks[4], (n_adapters, planes), jnp.float32)
    wfc = 0.2 * jax.random.normal(ks[5], (n_adapters, planes), jnp.float32)
    bfc = 0.1 * jax.random.normal(ks[6], (n_adapters,), jnp.float32)
    params = (w1, b1, w2, b2, wfc, bfc)

    ref = domain_attention_reference(x, params)

    # 1) Fused streaming path (the common case for slabs that fit VMEM).
    out_fused = domain_attention(x, params, path="fused")
    jax.block_until_ready(out_fused)
    assert out_fused.shape == x.shape and out_fused.dtype == x.dtype
    assert jnp.allclose(out_fused, ref, atol=1e-5, rtol=1e-5), \
        f"fused max abs err {jnp.max(jnp.abs(out_fused - ref))}"

    # 2) Tiled two-pass fallback (large-volume / single-batch-on-v7x path).
    out_tiled = domain_attention(x, params, path="tiled", tile_s=256)
    jax.block_until_ready(out_tiled)
    assert jnp.allclose(out_tiled, ref, atol=1e-5, rtol=1e-5), \
        f"tiled max abs err {jnp.max(jnp.abs(out_tiled - ref))}"

    # 3) bf16 activations end-to-end (halves HBM traffic); pooling accumulates
    #    in f32 and the broadcast multiply now stays in bf16.
    out_bf16 = domain_attention(x.astype(jnp.bfloat16), params, path="auto")
    jax.block_until_ready(out_bf16)
    assert out_bf16.dtype == jnp.bfloat16
    assert jnp.allclose(out_bf16.astype(jnp.float32), ref, atol=5e-2, rtol=5e-2), \
        f"bf16 max abs err {jnp.max(jnp.abs(out_bf16.astype(jnp.float32) - ref))}"

    print("KERNEL_OK")
</pallas_src>

<mosaic_0001>
module attributes {stable_mosaic.version = 11 : i64} {
  func.func @_fused_kernel(%arg0: i32, %arg1: memref<2x32x1024xf32, #tpu.memory_space<any>>, %arg2: memref<32x2xf32, #tpu.memory_space<vmem>>, %arg3: memref<1x2xf32, #tpu.memory_space<vmem>>, %arg4: memref<2x32x2xf32, #tpu.memory_space<vmem>>, %arg5: memref<2x1x2xf32, #tpu.memory_space<vmem>>, %arg6: memref<2x32x2xf32, #tpu.memory_space<vmem>>, %arg7: memref<2x32x1xf32, #tpu.memory_space<vmem>>, %arg8: memref<2x32x1024xf32, #tpu.memory_space<any>>, %arg9: memref<2x32x512xf32, #tpu.memory_space<vmem>>, %arg10: memref<2x!tpu.dma_semaphore, #tpu.memory_space<semaphore_mem>>, %arg11: memref<2x!tpu.dma_semaphore, #tpu.memory_space<semaphore_mem>>) attributes {dimension_semantics = [#tpu.dimension_semantics<parallel>], iteration_bounds = array<i64: 2>, scalar_prefetch = 0 : i64, scratch_operands = 3 : i64, tpu.core_type = #tpu.core_type<tc>, window_params = [{}, {pipeline_mode = #tpu.pipeline_mode<synchronous>, transform_indices = @transform_1, window_bounds = array<i64: 32, 2>}, {pipeline_mode = #tpu.pipeline_mode<synchronous>, transform_indices = @transform_2, window_bounds = array<i64: 1, 2>}, {pipeline_mode = #tpu.pipeline_mode<synchronous>, transform_indices = @transform_3, window_bounds = array<i64: 2, 32, 2>}, {pipeline_mode = #tpu.pipeline_mode<synchronous>, transform_indices = @transform_4, window_bounds = array<i64: 2, 1, 2>}, {pipeline_mode = #tpu.pipeline_mode<synchronous>, transform_indices = @transform_5, window_bounds = array<i64: 2, 32, 2>}, {pipeline_mode = #tpu.pipeline_mode<synchronous>, transform_indices = @transform_6, window_bounds = array<i64: 2, 32, 1>}, {}]} {
    %c0_i32 = arith.constant 0 : i32
    %c0_i32_0 = arith.constant 0 : i32
    %c0_i32_1 = arith.constant 0 : i32
    %c0_i32_2 = arith.constant 0 : i32
    %0 = tpu.memref_slice %arg1[%arg0, %c0_i32_1, %c0_i32_2] : memref<2x32x1024xf32, #tpu.memory_space<any>> -> memref<1x32x512xf32, #tpu.memory_space<any>>
    %1 = tpu.memref_squeeze %0 : memref<1x32x512xf32, #tpu.memory_space<any>> -> memref<32x512xf32, #tpu.memory_space<any>>
    %c0_i32_3 = arith.constant 0 : i32
    %c0_i32_4 = arith.constant 0 : i32
    %2 = tpu.memref_slice %arg9[%c0_i32, %c0_i32_3, %c0_i32_4] : memref<2x32x512xf32, #tpu.memory_space<vmem>> -> memref<1x32x512xf32, #tpu.memory_space<vmem>>
    %3 = tpu.memref_squeeze %2 : memref<1x32x512xf32, #tpu.memory_space<vmem>> -> memref<32x512xf32, #tpu.memory_space<vmem>>
    %4 = tpu.memref_slice %arg10[%c0_i32_0] : memref<2x!tpu.dma_semaphore, #tpu.memory_space<semaphore_mem>> -> memref<1x!tpu.dma_semaphore, #tpu.memory_space<semaphore_mem>>
    %5 = tpu.memref_squeeze %4 : memref<1x!tpu.dma_semaphore, #tpu.memory_space<semaphore_mem>> -> memref<!tpu.dma_semaphore, #tpu.memory_space<semaphore_mem>>
    tpu.enqueue_dma source(%1 : memref<32x512xf32, #tpu.memory_space<any>>) target(%3 : memref<32x512xf32, #tpu.memory_space<vmem>>) target_semaphore(%5 : memref<!tpu.dma_semaphore, #tpu.memory_space<semaphore_mem>>)
    %c1_i32 = arith.constant 1 : i32
    %c1_i32_5 = arith.constant 1 : i32
    %c0_i32_6 = arith.constant 0 : i32
    %c512_i32 = arith.constant 512 : i32
    %6 = tpu.memref_slice %arg1[%arg0, %c0_i32_6, %c512_i32] : memref<2x32x1024xf32, #tpu.memory_space<any>> -> memref<1x32x512xf32, #tpu.memory_space<any>>
    %7 = tpu.memref_squeeze %6 : memref<1x32x512xf32, #tpu.memory_space<any>> -> memref<32x512xf32, #tpu.memory_space<any>>
    %c0_i32_7 = arith.constant 0 : i32
    %c0_i32_8 = arith.constant 0 : i32
    %8 = tpu.memref_slice %arg9[%c1_i32, %c0_i32_7, %c0_i32_8] : memref<2x32x512xf32, #tpu.memory_space<vmem>> -> memref<1x32x512xf32, #tpu.memory_space<vmem>>
    %9 = tpu.memref_squeeze %8 : memref<1x32x512xf32, #tpu.memory_space<vmem>> -> memref<32x512xf32, #tpu.memory_space<vmem>>
    %10 = tpu.memref_slice %arg10[%c1_i32_5] : memref<2x!tpu.dma_semaphore, #tpu.memory_space<semaphore_mem>> -> memref<1x!tpu.dma_semaphore, #tpu.memory_space<semaphore_mem>>
    %11 = tpu.memref_squeeze %10 : memref<1x!tpu.dma_semaphore, #tpu.memory_space<semaphore_mem>> -> memref<!tpu.dma_semaphore, #tpu.memory_space<semaphore_mem>>
    tpu.enqueue_dma source(%7 : memref<32x512xf32, #tpu.memory_space<any>>) target(%9 : memref<32x512xf32, #tpu.memory_space<vmem>>) target_semaphore(%11 : memref<!tpu.dma_semaphore, #tpu.memory_space<semaphore_mem>>)
    %cst = arith.constant 0.000000e+00 : f32
    %12 = vector.broadcast %cst : f32 to vector<32x1xf32>
    %c0_i32_9 = arith.constant 0 : i32
    %c0_i32_10 = arith.constant 0 : i32
    %c0_i32_11 = arith.constant 0 : i32
    %c0_i32_12 = arith.constant 0 : i32
    %13 = tpu.memref_slice %arg1[%arg0, %c0_i32_11, %c0_i32_12] : memref<2x32x1024xf32, #tpu.memory_space<any>> -> memref<1x32x512xf32, #tpu.memory_space<any>>
    %14 = tpu.memref_squeeze %13 : memref<1x32x512xf32, #tpu.memory_space<any>> -> memref<32x512xf32, #tpu.memory_space<any>>
    %c0_i32_13 = arith.constant 0 : i32
    %c0_i32_14 = arith.constant 0 : i32
    %15 = tpu.memref_slice %arg9[%c0_i32_9, %c0_i32_13, %c0_i32_14] : memref<2x32x512xf32, #tpu.memory_space<vmem>> -> memref<1x32x512xf32, #tpu.memory_space<vmem>>
    %16 = tpu.memref_squeeze %15 : memref<1x32x512xf32, #tpu.memory_space<vmem>> -> memref<32x512xf32, #tpu.memory_space<vmem>>
    %17 = tpu.memref_slice %arg10[%c0_i32_10] : memref<2x!tpu.dma_semaphore, #tpu.memory_space<semaphore_mem>> -> memref<1x!tpu.dma_semaphore, #tpu.memory_space<semaphore_mem>>
    %18 = tpu.memref_squeeze %17 : memref<1x!tpu.dma_semaphore, #tpu.memory_space<semaphore_mem>> -> memref<!tpu.dma_semaphore, #tpu.memory_space<semaphore_mem>>
    tpu.wait_dma2 semaphore(%18 : memref<!tpu.dma_semaphore, #tpu.memory_space<semaphore_mem>>) src(%14 : memref<32x512xf32, #tpu.memory_space<any>>) dst(%16 : memref<32x512xf32, #tpu.memory_space<vmem>>)
    %c0 = arith.constant 0 : index
    %c0_15 = arith.constant 0 : index
    %c0_16 = arith.constant 0 : index
    %19 = vector.load %arg9[%c0, %c0_15, %c0_16] : memref<2x32x512xf32, #tpu.memory_space<vmem>>, vector<1x32x512xf32>
    %20 = vector.shape_cast %19 : vector<1x32x512xf32> to vector<32x512xf32>
    %cst_17 = arith.constant dense<0.000000e+00> : vector<32xf32>
    %21 = vector.multi_reduction <add>, %20, %cst_17 [1] : vector<32x512xf32> to vector<32xf32>
    %22 = vector.shape_cast %21 : vector<32xf32> to vector<32x1xf32>
    %23 = arith.addf %12, %22 : vector<32x1xf32>
    %c1_i32_18 = arith.constant 1 : i32
    %c1_i32_19 = arith.constant 1 : i32
    %c0_i32_20 = arith.constant 0 : i32
    %c512_i32_21 = arith.constant 512 : i32
    %24 = tpu.memref_slice %arg1[%arg0, %c0_i32_20, %c512_i32_21] : memref<2x32x1024xf32, #tpu.memory_space<any>> -> memref<1x32x512xf32, #tpu.memory_space<any>>
    %25 = tpu.memref_squeeze %24 : memref<1x32x512xf32, #tpu.memory_space<any>> -> memref<32x512xf32, #tpu.memory_space<any>>
    %c0_i32_22 = arith.constant 0 : i32
    %c0_i32_23 = arith.constant 0 : i32
    %26 = tpu.memref_slice %arg9[%c1_i32_18, %c0_i32_22, %c0_i32_23] : memref<2x32x512xf32, #tpu.memory_space<vmem>> -> memref<1x32x512xf32, #tpu.memory_space<vmem>>
    %27 = tpu.memref_squeeze %26 : memref<1x32x512xf32, #tpu.memory_space<vmem>> -> memref<32x512xf32, #tpu.memory_space<vmem>>
    %28 = tpu.memref_slice %arg10[%c1_i32_19] : memref<2x!tpu.dma_semaphore, #tpu.memory_space<semaphore_mem>> -> memref<1x!tpu.dma_semaphore, #tpu.memory_space<semaphore_mem>>
    %29 = tpu.memref_squeeze %28 : memref<1x!tpu.dma_semaphore, #tpu.memory_space<semaphore_mem>> -> memref<!tpu.dma_semaphore, #tpu.memory_space<semaphore_mem>>
    tpu.wait_dma2 semaphore(%29 : memref<!tpu.dma_semaphore, #tpu.memory_space<semaphore_mem>>) src(%25 : memref<32x512xf32, #tpu.memory_space<any>>) dst(%27 : memref<32x512xf32, #tpu.memory_space<vmem>>)
    %c1 = arith.constant 1 : index
    %c0_24 = arith.constant 0 : index
    %c0_25 = arith.constant 0 : index
    %30 = vector.load %arg9[%c1, %c0_24, %c0_25] : memref<2x32x512xf32, #tpu.memory_space<vmem>>, vector<1x32x512xf32>
    %31 = vector.shape_cast %30 : vector<1x32x512xf32> to vector<32x512xf32>
    %cst_26 = arith.constant dense<0.000000e+00> : vector<32xf32>
    %32 = vector.multi_reduction <add>, %31, %cst_26 [1] : vector<32x512xf32> to vector<32xf32>
    %33 = vector.shape_cast %32 : vector<32xf32> to vector<32x1xf32>
    %34 = arith.addf %23, %33 : vector<32x1xf32>
    %cst_27 = arith.constant 9.765625E-4 : f32
    %35 = vector.broadcast %cst_27 : f32 to vector<32x1xf32>
    %36 = arith.mulf %34, %35 : vector<32x1xf32>
    %c0_28 = arith.constant 0 : index
    %c0_29 = arith.constant 0 : index
    %37 = vector.load %arg2[%c0_28, %c0_29] : memref<32x2xf32, #tpu.memory_space<vmem>>, vector<32x2xf32>
    %38 = vector.broadcast %36 : vector<32x1xf32> to vector<32x2xf32>
    %39 = arith.mulf %37, %38 : vector<32x2xf32>
    %cst_30 = arith.constant dense<0.000000e+00> : vector<2xf32>
    %40 = vector.multi_reduction <add>, %39, %cst_30 [0] : vector<32x2xf32> to vector<2xf32>
    %41 = vector.shape_cast %40 : vector<2xf32> to vector<1x2xf32>
    %c0_31 = arith.constant 0 : index
    %c0_32 = arith.constant 0 : index
    %42 = vector.load %arg3[%c0_31, %c0_32] : memref<1x2xf32, #tpu.memory_space<vmem>>, vector<1x2xf32>
    %43 = arith.addf %41, %42 : vector<1x2xf32>
    %cst_33 = arith.constant dense<0xFF800000> : vector<1xf32>
    %44 = vector.multi_reduction <maximumf>, %43, %cst_33 [1] : vector<1x2xf32> to vector<1xf32>
    %45 = vector.shape_cast %44 : vector<1xf32> to vector<1x1xf32>
    %46 = vector.broadcast %45 : vector<1x1xf32> to vector<1x2xf32>
    %47 = arith.subf %43, %46 : vector<1x2xf32>
    %48 = math.exp %47 : vector<1x2xf32>
    %cst_34 = arith.constant dense<0.000000e+00> : vector<1xf32>
    %49 = vector.multi_reduction <add>, %48, %cst_34 [1] : vector<1x2xf32> to vector<1xf32>
    %50 = vector.shape_cast %49 : vector<1xf32> to vector<1x1xf32>
    %51 = vector.broadcast %50 : vector<1x1xf32> to vector<1x2xf32>
    %52 = arith.divf %48, %51 : vector<1x2xf32>
    %cst_35 = arith.constant 0.000000e+00 : f32
    %53 = vector.broadcast %cst_35 : f32 to vector<32x1xf32>
    %c0_36 = arith.constant 0 : index
    %c0_37 = arith.constant 0 : index
    %c0_38 = arith.constant 0 : index
    %54 = vector.load %arg4[%c0_36, %c0_37, %c0_38] : memref<2x32x2xf32, #tpu.memory_space<vmem>>, vector<1x32x2xf32>
    %55 = vector.shape_cast %54 : vector<1x32x2xf32> to vector<32x2xf32>
    %56 = vector.broadcast %36 : vector<32x1xf32> to vector<32x2xf32>
    %57 = arith.mulf %55, %56 : vector<32x2xf32>
    %cst_39 = arith.constant dense<0.000000e+00> : vector<2xf32>
    %58 = vector.multi_reduction <add>, %57, %cst_39 [0] : vector<32x2xf32> to vector<2xf32>
    %59 = vector.shape_cast %58 : vector<2xf32> to vector<1x2xf32>
    %c0_40 = arith.constant 0 : index
    %c0_41 = arith.constant 0 : index
    %c0_42 = arith.constant 0 : index
    %60 = vector.load %arg5[%c0_40, %c0_41, %c0_42] : memref<2x1x2xf32, #tpu.memory_space<vmem>>, vector<1x1x2xf32>
    %61 = vector.shape_cast %60 : vector<1x1x2xf32> to vector<1x2xf32>
    %62 = arith.addf %59, %61 : vector<1x2xf32>
    %cst_43 = arith.constant 0.000000e+00 : f32
    %63 = vector.broadcast %cst_43 : f32 to vector<1x2xf32>
    %64 = arith.maximumf %62, %63 : vector<1x2xf32>
    %c0_44 = arith.constant 0 : index
    %c0_45 = arith.constant 0 : index
    %c0_46 = arith.constant 0 : index
    %65 = vector.load %arg6[%c0_44, %c0_45, %c0_46] : memref<2x32x2xf32, #tpu.memory_space<vmem>>, vector<1x32x2xf32>
    %66 = vector.shape_cast %65 : vector<1x32x2xf32> to vector<32x2xf32>
    %67 = vector.broadcast %64 : vector<1x2xf32> to vector<32x2xf32>
    %68 = arith.mulf %66, %67 : vector<32x2xf32>
    %cst_47 = arith.constant dense<0.000000e+00> : vector<32xf32>
    %69 = vector.multi_reduction <add>, %68, %cst_47 [1] : vector<32x2xf32> to vector<32xf32>
    %70 = vector.shape_cast %69 : vector<32xf32> to vector<32x1xf32>
    %c0_48 = arith.constant 0 : index
    %c0_49 = arith.constant 0 : index
    %c0_50 = arith.constant 0 : index
    %71 = vector.load %arg7[%c0_48, %c0_49, %c0_50] : memref<2x32x1xf32, #tpu.memory_space<vmem>>, vector<1x32x1xf32>
    %72 = vector.shape_cast %71 : vector<1x32x1xf32> to vector<32x1xf32>
    %73 = arith.addf %70, %72 : vector<32x1xf32>
    %74 = vector.extract_strided_slice %52 {offsets = [0, 0], sizes = [1, 1], strides = [1, 1]} : vector<1x2xf32> to vector<1x1xf32>
    %75 = vector.broadcast %74 : vector<1x1xf32> to vector<32x1xf32>
    %76 = arith.mulf %73, %75 : vector<32x1xf32>
    %77 = arith.addf %53, %76 : vector<32x1xf32>
    %c1_51 = arith.constant 1 : index
    %c0_52 = arith.constant 0 : index
    %c0_53 = arith.constant 0 : index
    %78 = vector.load %arg4[%c1_51, %c0_52, %c0_53] : memref<2x32x2xf32, #tpu.memory_space<vmem>>, vector<1x32x2xf32>
    %79 = vector.shape_cast %78 : vector<1x32x2xf32> to vector<32x2xf32>
    %80 = vector.broadcast %36 : vector<32x1xf32> to vector<32x2xf32>
    %81 = arith.mulf %79, %80 : vector<32x2xf32>
    %cst_54 = arith.constant dense<0.000000e+00> : vector<2xf32>
    %82 = vector.multi_reduction <add>, %81, %cst_54 [0] : vector<32x2xf32> to vector<2xf32>
    %83 = vector.shape_cast %82 : vector<2xf32> to vector<1x2xf32>
    %c1_55 = arith.constant 1 : index
    %c0_56 = arith.constant 0 : index
    %c0_57 = arith.constant 0 : index
    %84 = vector.load %arg5[%c1_55, %c0_56, %c0_57] : memref<2x1x2xf32, #tpu.memory_space<vmem>>, vector<1x1x2xf32>
    %85 = vector.shape_cast %84 : vector<1x1x2xf32> to vector<1x2xf32>
    %86 = arith.addf %83, %85 : vector<1x2xf32>
    %cst_58 = arith.constant 0.000000e+00 : f32
    %87 = vector.broadcast %cst_58 : f32 to vector<1x2xf32>
    %88 = arith.maximumf %86, %87 : vector<1x2xf32>
    %c1_59 = arith.constant 1 : index
    %c0_60 = arith.constant 0 : index
    %c0_61 = arith.constant 0 : index
    %89 = vector.load %arg6[%c1_59, %c0_60, %c0_61] : memref<2x32x2xf32, #tpu.memory_space<vmem>>, vector<1x32x2xf32>
    %90 = vector.shape_cast %89 : vector<1x32x2xf32> to vector<32x2xf32>
    %91 = vector.broadcast %88 : vector<1x2xf32> to vector<32x2xf32>
    %92 = arith.mulf %90, %91 : vector<32x2xf32>
    %cst_62 = arith.constant dense<0.000000e+00> : vector<32xf32>
    %93 = vector.multi_reduction <add>, %92, %cst_62 [1] : vector<32x2xf32> to vector<32xf32>
    %94 = vector.shape_cast %93 : vector<32xf32> to vector<32x1xf32>
    %c1_63 = arith.constant 1 : index
    %c0_64 = arith.constant 0 : index
    %c0_65 = arith.constant 0 : index
    %95 = vector.load %arg7[%c1_63, %c0_64, %c0_65] : memref<2x32x1xf32, #tpu.memory_space<vmem>>, vector<1x32x1xf32>
    %96 = vector.shape_cast %95 : vector<1x32x1xf32> to vector<32x1xf32>
    %97 = arith.addf %94, %96 : vector<32x1xf32>
    %98 = vector.extract_strided_slice %52 {offsets = [0, 1], sizes = [1, 1], strides = [1, 1]} : vector<1x2xf32> to vector<1x1xf32>
    %99 = vector.broadcast %98 : vector<1x1xf32> to vector<32x1xf32>
    %100 = arith.mulf %97, %99 : vector<32x1xf32>
    %101 = arith.addf %77, %100 : vector<32x1xf32>
    %102 = arith.negf %101 : vector<32x1xf32>
    %103 = math.exp %102 : vector<32x1xf32>
    %cst_66 = arith.constant 1.000000e+00 : f32
    %104 = vector.broadcast %cst_66 : f32 to vector<32x1xf32>
    %105 = arith.addf %104, %103 : vector<32x1xf32>
    %106 = arith.divf %104, %105 : vector<32x1xf32>
    %c0_67 = arith.constant 0 : index
    %c0_68 = arith.constant 0 : index
    %c0_69 = arith.constant 0 : index
    %107 = vector.load %arg9[%c0_67, %c0_68, %c0_69] : memref<2x32x512xf32, #tpu.memory_space<vmem>>, vector<1x32x512xf32>
    %108 = vector.shape_cast %107 : vector<1x32x512xf32> to vector<32x512xf32>
    %109 = vector.broadcast %106 : vector<32x1xf32> to vector<32x512xf32>
    %110 = arith.mulf %108, %109 : vector<32x512xf32>
    %c0_70 = arith.constant 0 : index
    %c0_71 = arith.constant 0 : index
    %c0_72 = arith.constant 0 : index
    %111 = vector.load %arg9[%c0_70, %c0_71, %c0_72] : memref<2x32x512xf32, #tpu.memory_space<vmem>>, vector<1x32x512xf32>
    %112 = vector.shape_cast %111 : vector<1x32x512xf32> to vector<32x512xf32>
    %113 = vector.shape_cast %110 : vector<32x512xf32> to vector<1x32x512xf32>
    tpu.vector_store %arg9[%c0_70, %c0_71, %c0_72], %113 {strides = array<i32>} : memref<2x32x512xf32, #tpu.memory_space<vmem>>, vector<1x32x512xf32>,
    %c0_i32_73 = arith.constant 0 : i32
    %c0_i32_74 = arith.constant 0 : i32
    %c0_i32_75 = arith.constant 0 : i32
    %c0_i32_76 = arith.constant 0 : i32
    %114 = tpu.memref_slice %arg9[%c0_i32_73, %c0_i32_75, %c0_i32_76] : memref<2x32x512xf32, #tpu.memory_space<vmem>> -> memref<1x32x512xf32, #tpu.memory_space<vmem>>
    %115 = tpu.memref_squeeze %114 : memref<1x32x512xf32, #tpu.memory_space<vmem>> -> memref<32x512xf32, #tpu.memory_space<vmem>>
    %c0_i32_77 = arith.constant 0 : i32
    %c0_i32_78 = arith.constant 0 : i32
    %116 = tpu.memref_slice %arg8[%arg0, %c0_i32_77, %c0_i32_78] : memref<2x32x1024xf32, #tpu.memory_space<any>> -> memref<1x32x512xf32, #tpu.memory_space<any>>
    %117 = tpu.memref_squeeze %116 : memref<1x32x512xf32, #tpu.memory_space<any>> -> memref<32x512xf32, #tpu.memory_space<any>>
    %118 = tpu.memref_slice %arg11[%c0_i32_74] : memref<2x!tpu.dma_semaphore, #tpu.memory_space<semaphore_mem>> -> memref<1x!tpu.dma_semaphore, #tpu.memory_space<semaphore_mem>>
    %119 = tpu.memref_squeeze %118 : memref<1x!tpu.dma_semaphore, #tpu.memory_space<semaphore_mem>> -> memref<!tpu.dma_semaphore, #tpu.memory_space<semaphore_mem>>
    tpu.enqueue_dma source(%115 : memref<32x512xf32, #tpu.memory_space<vmem>>) target(%117 : memref<32x512xf32, #tpu.memory_space<any>>) target_semaphore(%119 : memref<!tpu.dma_semaphore, #tpu.memory_space<semaphore_mem>>)
    %c1_79 = arith.constant 1 : index
    %c0_80 = arith.constant 0 : index
    %c0_81 = arith.constant 0 : index
    %120 = vector.load %arg9[%c1_79, %c0_80, %c0_81] : memref<2x32x512xf32, #tpu.memory_space<vmem>>, vector<1x32x512xf32>
    %121 = vector.shape_cast %120 : vector<1x32x512xf32> to vector<32x512xf32>
    %122 = vector.broadcast %106 : vector<32x1xf32> to vector<32x512xf32>
    %123 = arith.mulf %121, %122 : vector<32x512xf32>
    %c1_82 = arith.constant 1 : index
    %c0_83 = arith.constant 0 : index
    %c0_84 = arith.constant 0 : index
    %124 = vector.load %arg9[%c1_82, %c0_83, %c0_84] : memref<2x32x512xf32, #tpu.memory_space<vmem>>, vector<1x32x512xf32>
    %125 = vector.shape_cast %124 : vector<1x32x512xf32> to vector<32x512xf32>
    %126 = vector.shape_cast %123 : vector<32x512xf32> to vector<1x32x512xf32>
    tpu.vector_store %arg9[%c1_82, %c0_83, %c0_84], %126 {strides = array<i32>} : memref<2x32x512xf32, #tpu.memory_space<vmem>>, vector<1x32x512xf32>,
    %c1_i32_85 = arith.constant 1 : i32
    %c1_i32_86 = arith.constant 1 : i32
    %c0_i32_87 = arith.constant 0 : i32
    %c0_i32_88 = arith.constant 0 : i32
    %127 = tpu.memref_slice %arg9[%c1_i32_85, %c0_i32_87, %c0_i32_88] : memref<2x32x512xf32, #tpu.memory_space<vmem>> -> memref<1x32x512xf32, #tpu.memory_space<vmem>>
    %128 = tpu.memref_squeeze %127 : memref<1x32x512xf32, #tpu.memory_space<vmem>> -> memref<32x512xf32, #tpu.memory_space<vmem>>
    %c0_i32_89 = arith.constant 0 : i32
    %c512_i32_90 = arith.constant 512 : i32
    %129 = tpu.memref_slice %arg8[%arg0, %c0_i32_89, %c512_i32_90] : memref<2x32x1024xf32, #tpu.memory_space<any>> -> memref<1x32x512xf32, #tpu.memory_space<any>>
    %130 = tpu.memref_squeeze %129 : memref<1x32x512xf32, #tpu.memory_space<any>> -> memref<32x512xf32, #tpu.memory_space<any>>
    %131 = tpu.memref_slice %arg11[%c1_i32_86] : memref<2x!tpu.dma_semaphore, #tpu.memory_space<semaphore_mem>> -> memref<1x!tpu.dma_semaphore, #tpu.memory_space<semaphore_mem>>
    %132 = tpu.memref_squeeze %131 : memref<1x!tpu.dma_semaphore, #tpu.memory_space<semaphore_mem>> -> memref<!tpu.dma_semaphore, #tpu.memory_space<semaphore_mem>>
    tpu.enqueue_dma source(%128 : memref<32x512xf32, #tpu.memory_space<vmem>>) target(%130 : memref<32x512xf32, #tpu.memory_space<any>>) target_semaphore(%132 : memref<!tpu.dma_semaphore, #tpu.memory_space<semaphore_mem>>)
    %c0_i32_91 = arith.constant 0 : i32
    %c0_i32_92 = arith.constant 0 : i32
    %c0_i32_93 = arith.constant 0 : i32
    %c0_i32_94 = arith.constant 0 : i32
    %133 = tpu.memref_slice %arg9[%c0_i32_91, %c0_i32_93, %c0_i32_94] : memref<2x32x512xf32, #tpu.memory_space<vmem>> -> memref<1x32x512xf32, #tpu.memory_space<vmem>>
    %134 = tpu.memref_squeeze %133 : memref<1x32x512xf32, #tpu.memory_space<vmem>> -> memref<32x512xf32, #tpu.memory_space<vmem>>
    %c0_i32_95 = arith.constant 0 : i32
    %c0_i32_96 = arith.constant 0 : i32
    %135 = tpu.memref_slice %arg8[%arg0, %c0_i32_95, %c0_i32_96] : memref<2x32x1024xf32, #tpu.memory_space<any>> -> memref<1x32x512xf32, #tpu.memory_space<any>>
    %136 = tpu.memref_squeeze %135 : memref<1x32x512xf32, #tpu.memory_space<any>> -> memref<32x512xf32, #tpu.memory_space<any>>
    %137 = tpu.memref_slice %arg11[%c0_i32_92] : memref<2x!tpu.dma_semaphore, #tpu.memory_space<semaphore_mem>> -> memref<1x!tpu.dma_semaphore, #tpu.memory_space<semaphore_mem>>
    %138 = tpu.memref_squeeze %137 : memref<1x!tpu.dma_semaphore, #tpu.memory_space<semaphore_mem>> -> memref<!tpu.dma_semaphore, #tpu.memory_space<semaphore_mem>>
    tpu.wait_dma2 semaphore(%138 : memref<!tpu.dma_semaphore, #tpu.memory_space<semaphore_mem>>) src(%134 : memref<32x512xf32, #tpu.memory_space<vmem>>) dst(%136 : memref<32x512xf32, #tpu.memory_space<any>>)
    %c1_i32_97 = arith.constant 1 : i32
    %c1_i32_98 = arith.constant 1 : i32
    %c0_i32_99 = arith.constant 0 : i32
    %c0_i32_100 = arith.constant 0 : i32
    %139 = tpu.memref_slice %arg9[%c1_i32_97, %c0_i32_99, %c0_i32_100] : memref<2x32x512xf32, #tpu.memory_space<vmem>> -> memref<1x32x512xf32, #tpu.memory_space<vmem>>
    %140 = tpu.memref_squeeze %139 : memref<1x32x512xf32, #tpu.memory_space<vmem>> -> memref<32x512xf32, #tpu.memory_space<vmem>>
    %c0_i32_101 = arith.constant 0 : i32
    %c512_i32_102 = arith.constant 512 : i32
    %141 = tpu.memref_slice %arg8[%arg0, %c0_i32_101, %c512_i32_102] : memref<2x32x1024xf32, #tpu.memory_space<any>> -> memref<1x32x512xf32, #tpu.memory_space<any>>
    %142 = tpu.memref_squeeze %141 : memref<1x32x512xf32, #tpu.memory_space<any>> -> memref<32x512xf32, #tpu.memory_space<any>>
    %143 = tpu.memref_slice %arg11[%c1_i32_98] : memref<2x!tpu.dma_semaphore, #tpu.memory_space<semaphore_mem>> -> memref<1x!tpu.dma_semaphore, #tpu.memory_space<semaphore_mem>>
    %144 = tpu.memref_squeeze %143 : memref<1x!tpu.dma_semaphore, #tpu.memory_space<semaphore_mem>> -> memref<!tpu.dma_semaphore, #tpu.memory_space<semaphore_mem>>
    tpu.wait_dma2 semaphore(%144 : memref<!tpu.dma_semaphore, #tpu.memory_space<semaphore_mem>>) src(%140 : memref<32x512xf32, #tpu.memory_space<vmem>>) dst(%142 : memref<32x512xf32, #tpu.memory_space<any>>)
    return
  }
  func.func @transform_1(%arg0: i32) -> (i32, i32) {
    %c0_i32 = arith.constant 0 : i32
    %c0_i32_0 = arith.constant 0 : i32
    %c0_i32_1 = arith.constant 0 : i32
    return %c0_i32, %c0_i32_0 : i32, i32
  }
  func.func @transform_2(%arg0: i32) -> (i32, i32) {
    %c0_i32 = arith.constant 0 : i32
    %c0_i32_0 = arith.constant 0 : i32
    %c0_i32_1 = arith.constant 0 : i32
    return %c0_i32, %c0_i32_0 : i32, i32
  }
  func.func @transform_3(%arg0: i32) -> (i32, i32, i32) {
    %c0_i32 = arith.constant 0 : i32
    %c0_i32_0 = arith.constant 0 : i32
    %c0_i32_1 = arith.constant 0 : i32
    %c0_i32_2 = arith.constant 0 : i32
    return %c0_i32, %c0_i32_0, %c0_i32_1 : i32, i32, i32
  }
  func.func @transform_4(%arg0: i32) -> (i32, i32, i32) {
    %c0_i32 = arith.constant 0 : i32
    %c0_i32_0 = arith.constant 0 : i32
    %c0_i32_1 = arith.constant 0 : i32
    %c0_i32_2 = arith.constant 0 : i32
    return %c0_i32, %c0_i32_0, %c0_i32_1 : i32, i32, i32
  }
  func.func @transform_5(%arg0: i32) -> (i32, i32, i32) {
    %c0_i32 = arith.constant 0 : i32
    %c0_i32_0 = arith.constant 0 : i32
    %c0_i32_1 = arith.constant 0 : i32
    %c0_i32_2 = arith.constant 0 : i32
    return %c0_i32, %c0_i32_0, %c0_i32_1 : i32, i32, i32
  }
  func.func @transform_6(%arg0: i32) -> (i32, i32, i32) {
    %c0_i32 = arith.constant 0 : i32
    %c0_i32_0 = arith.constant 0 : i32
    %c0_i32_1 = arith.constant 0 : i32
    %c0_i32_2 = arith.constant 0 : i32
    return %c0_i32, %c0_i32_0, %c0_i32_1 : i32, i32, i32
  }
}

</mosaic_0001>

<bundles_post_ra>
// kernel: tpu_custom_call.1
= control target key start
LH: loop header
LB: loop body
LE: loop exit
PB: predicated region body
PF: predicated region fallthrough
CT: control target
= control target key end

     0   :  { %s869_s24 = smov 0   ;;  %s1191_s0 = inlined_call_operand.hbm [shape: f32[2,32,1024], index: 0, kind: input, shape index: {}]   ;;  %s1192_s1 = inlined_call_operand.vmem [shape: f32[32,2], index: 1, kind: input, shape index: {}]   ;;  %s1193_s2 = inlined_call_operand.vmem [shape: f32[1,2], index: 2, kind: input, shape index: {}]   ;;  %s1194_s3 = inlined_call_operand.vmem [shape: f32[2,32,2], index: 3, kind: input, shape index: {}]   ;;  %s1195_s4 = inlined_call_operand.vmem [shape: f32[2,1,2], index: 4, kind: input, shape index: {}]   ;;  %s1196_s5 = inlined_call_operand.vmem [shape: f32[2,32,2], index: 5, kind: input, shape index: {}]   ;;  %s1197_s6 = inlined_call_operand.vmem [shape: f32[2,32,1], index: 6, kind: input, shape index: {}]   ;;  %s1198_s7 = inlined_call_operand.hbm [shape: f32[2,32,1024], index: 7, kind: output, shape index: {}]  }
   0x1 LB: > { %s634_s25 = sadd.s32 4294967295, %s820_s24   ;;  %p638_p0 = scmp.lt.s32.totalorder %s820_s24, 1  ;;  %s820_s24 = sphi %s869_s24, %s17_s24  }
   0x2   : > { %s876_s26 = sshll.u32 (!%p638_p0), %s634_s25, 12  ;;  %s822_s30 = smov (!%p638_p0), [#allocation2]  }
   0x3   : > { %134 = sbr.rel (%p638_p0) target bundleno = 1021 (0x3fd), region = 44  ;;  %s882_s29 = scalar_lea.hbm (!%p638_p0), %s1191_s0, %s876_s26 }
   0x4   : > { %s152_s8 = sshll.u32 (!%p638_p0), %s822_s30, 4  ;;  %s708_s9 = scalar_lea.hbm (!%p638_p0), %s882_s29, 2048  ;;  %s884_s8 = int_to_ptr.vmem [resolvable:$true] %s152_s8 }
   0x5   : > { %p709_p1 = scmp.ne.s32.totalorder (!%p638_p0), %s882_s29, %s708_s9  ;;  %s710_s12 = scalar_lea.hbm (!%p638_p0), %s1191_s0, 8192 }
   0x6   : > { %p711_p2 = scmp.lt.u32.totalorder (!%p638_p0), %s882_s29, %s1191_s0  ;;  %p712_p3 = scmp.lt.u32.totalorder (!%p638_p0), %s710_s12, %s708_s9 }
   0x7   : > { %p714_p5 = scmp.lt.u32.totalorder (!%p638_p0), %s708_s9, %s882_s29 }
   0x8   : > { %p713_p4 = por (!%p638_p0), %p712_p3, %p711_p2 }
   0xa   : > { %p715_p6 = por %p714_p5, %p713_p4 }
   0xc   : > { %p716_p7 = pnand %p715_p6, %p709_p1 }
   0xe   : > { %719 = shalt.err (!%p716_p7)  }
   0xf   : > { %s720_s15 = scalar_lea.vmem %s884_s8, 2048  ;;  %s724_s17 = scalar_lea.vmem %s884_s8, 4096 }
  0x10   : > { %p898_p8 = scmp.ne.s32.totalorder %s884_s8, %s720_s15  ;;  %p725_p9 = scmp.lt.s32.totalorder %s884_s8, %s884_s8 }
  0x11   : > { %p726_p10 = scmp.lt.s32.totalorder %s724_s17, %s720_s15 }
  0x13   : > { %p905_p11 = por %p726_p10, %p725_p9 }
  0x15   : > { %p728_p12 = pnand %p905_p11, %p898_p8 }
  0x17   : > { %731 = shalt.err (!%p728_p12)  }
  0x18   : > { %s823_s19 = smov 1024   ;;  %s824_s20 = smov 512  }
  0x19   : > { %s825_s21 = smov 32   ;;  %s622_s22 = scalar_lea.hbm %s882_s29, 512 }
  0x1a   : > { %155 = dma.hbm_to_vmem [thread:$0]  %s882_s29, 2048, %s884_s8, [#allocation3], %s823_s19, %s824_s20, %s825_s21 }
  0x1b   : > { %s826_s23 = smov [#allocation2 + $0x80]   ;;  %s756_s27 = scalar_lea.hbm %s882_s29, 2560 }
  0x1c   : > { %s162_s25 = sshll.u32 %s826_s23, 4  ;;  %p733_p13 = scmp.ne.s32.totalorder %s622_s22, %s756_s27  ;;  %s924_s25 = int_to_ptr.vmem [resolvable:$true] %s162_s25 }
  0x1d   : > { %p735_p0 = scmp.lt.u32.totalorder %s622_s22, %s1191_s0  ;;  %p736_p1 = scmp.lt.u32.totalorder %s710_s12, %s756_s27 }
  0x1e   : > { %p738_p3 = scmp.lt.u32.totalorder %s756_s27, %s622_s22 }
  0x1f   : > { %p737_p2 = por %p736_p1, %p735_p0 }
  0x21   : > { %p739_p4 = por %p738_p3, %p737_p2 }
  0x23   : > { %p740_p5 = pnand %p739_p4, %p733_p13 }
  0x25   : > { %743 = shalt.err (!%p740_p5)  }
  0x26   : > { %s744_s9 = scalar_lea.vmem %s924_s25, 2048  ;;  %p749_p7 = scmp.lt.s32.totalorder %s924_s25, %s884_s8 }
  0x27   : > { %p932_p6 = scmp.ne.s32.totalorder %s924_s25, %s744_s9  ;;  %p750_p9 = scmp.lt.s32.totalorder %s724_s17, %s744_s9 }
  0x29   : > { %p938_p10 = por %p750_p9, %p749_p7 }
  0x2b   : > { %p752_p13 = pnand %p938_p10, %p932_p6 }
  0x2d   : > { %755 = shalt.err (!%p752_p13)  }
  0x2e   : > { %165 = dma.hbm_to_vmem [thread:$0]  %s622_s22, 2048, %s924_s25, [#allocation3 + $0x1], %s823_s19, %s824_s20, %s825_s21 }
  0x2f   : > { %810 = dma.done.wait [#allocation3], 2048 }
  0x30   : > { %811 = vsyncadd [#allocation3], 4294965248  ;;  %v178_v0 = vld [vmem:[#allocation2 + $0x40] sm:$0xff]  ;;  %v179_v1 = vld [vmem:[#allocation2 + $0x48] sm:$0xff] }
  0x31   : > { %v180_v2 = vld [vmem:[#allocation2 + $0x50] sm:$0xff]  ;;  %v196_v3 = vadd.f32 %v179_v1, %v178_v0  ;;  %v170_v4 = vld [vmem:[#allocation2] sm:$0xff]  ;;  %v171_v5 = vld [vmem:[#allocation2 + $0x8] sm:$0xff] }
  0x32   : > { %v181_v6 = vld [vmem:[#allocation2 + $0x58] sm:$0xff]  ;;  %v172_v7 = vld [vmem:[#allocation2 + $0x10] sm:$0xff]  ;;  %v186_v8 = vadd.f32 %v171_v5, %v170_v4  ;;  %v182_v9 = vld [vmem:[#allocation2 + $0x60] sm:$0xff] }
  0x33   : > { %v197_v10 = vadd.f32 %v196_v3, %v180_v2  ;;  %v173_v11 = vld [vmem:[#allocation2 + $0x18] sm:$0xff]  ;;  %v183_v12 = vld [vmem:[#allocation2 + $0x68] sm:$0xff]  ;;  %v184_v13 = vld [vmem:[#allocation2 + $0x70] sm:$0xff] }
  0x34   : > { %v187_v14 = vadd.f32 %v186_v8, %v172_v7  ;;  %v201_v15 = vadd.f32 %v183_v12, %v182_v9  ;;  %v174_v16 = vld [vmem:[#allocation2 + $0x20] sm:$0xff]  ;;  %v175_v17 = vld [vmem:[#allocation2 + $0x28] sm:$0xff]  ;;  %v176_v18 = vld [vmem:[#allocation2 + $0x30] sm:$0xff] }
  0x35   : > { %v198_v19 = vadd.f32 %v197_v10, %v181_v6  ;;  %v185_v20 = vld [vmem:[#allocation2 + $0x78] sm:$0xff]  ;;  %v191_v21 = vadd.f32 %v175_v17, %v174_v16 }
  0x36   : > { %v188_v22 = vadd.f32 %v187_v14, %v173_v11  ;;  %v202_v23 = vadd.f32 %v201_v15, %v184_v13  ;;  %v177_v24 = vld [vmem:[#allocation2 + $0x38] sm:$0xff] }
  0x37   : > { %199 = vadd.xlane.f32.xlu1 %v198_v19  ;;  %v192_v25 = vadd.f32 %v191_v21, %v176_v18 }
  0x38   : > { %189 = vadd.xlane.f32.xlu0 %v188_v22  ;;  %v203_v26 = vadd.f32 %v202_v23, %v185_v20 }
  0x39   : > { %v193_v27 = vadd.f32 %v192_v25, %v177_v24 }
  0x3b   : > { %204 = vadd.xlane.f32.xlu1 %v203_v26 }
  0x3c   : > { %194 = vadd.xlane.f32.xlu0 %v193_v27 }
  0xc4   : > { %v200_v28 = vpop.xlane.xlu1 %199 }
  0xc5   : > { %v190_v29 = vpop.xlane.xlu0 %189 }
  0xc8   : > { %v205_v30 = vpop.xlane.xlu1 %204 }
  0xc9   : > { %v195_v31 = vpop.xlane.xlu0 %194 }
  0xca   : > { %812 = dma.done.wait [#allocation3 + $0x1], 2048 }
  0xcb   : > { %813 = vsyncadd [#allocation3 + $0x1], 4294965248  ;;  %v955_v32 = vld [vmem:[#allocation2 + $0x80] sm:$0xff]  ;;  %v957_v33 = vld [vmem:[#allocation2 + $0x88] sm:$0xff]  ;;  %vm264_vm0 = vcmask 15360   ;;  %vm280_vm1 = vcmask 8192   ;;  %s1130_s17 = scalar_lea.hbm %s1198_s7, %s876_s26 }
  0xcc   : > { %v959_v34 = vld [vmem:[#allocation2 + $0x90] sm:$0xff]  ;;  %v228_v35 = vadd.f32 %v957_v33, %v955_v32  ;;  %v963_v36 = vld [vmem:[#allocation2 + $0xc0] sm:$0xff]  ;;  %v965_v37 = vld [vmem:[#allocation2 + $0xc8] sm:$0xff]  ;;  %s827_s30 = smov 127   ;;  %s1141_s26 = scalar_lea.hbm %s1130_s17, 512 }
  0xcd   : > { %v967_v38 = vld [vmem:[#allocation2 + $0x98] sm:$0xff]  ;;  %v969_v39 = vld [vmem:[#allocation2 + $0xd0] sm:$0xff]  ;;  %v238_v40 = vadd.f32 %v965_v37, %v963_v36  ;;  %v973_v41 = vld [vmem:[#allocation2 + $0xa0] sm:$0xff] }
  0xce   : > { %v229_v42 = vadd.f32 %v228_v35, %v959_v34  ;;  %v976_v43 = vld [vmem:[#allocation2 + $0xd8] sm:$0xff]  ;;  %v978_v44 = vld [vmem:[#allocation2 + $0xa8] sm:$0xff]  ;;  %v980_v45 = vld [vmem:[#allocation2 + $0xb0] sm:$0xff] }
  0xcf   : > { %v239_v46 = vadd.f32 %v238_v40, %v969_v39  ;;  %v233_v47 = vadd.f32 %v978_v44, %v973_v41  ;;  %v985_v48 = vld [vmem:[#allocation2 + $0xe0] sm:$0xff]  ;;  %v987_v49 = vld [vmem:[#allocation2 + $0xe8] sm:$0xff]  ;;  %v989_v50 = vld [vmem:[#allocation2 + $0xf0] sm:$0xff] }
  0xd0   : > { %v230_v51 = vadd.f32 %v229_v42, %v967_v38  ;;  %v992_v52 = vld [vmem:[#allocation2 + $0xb8] sm:$0xff]  ;;  %v243_v53 = vadd.f32 %v987_v49, %v985_v48  ;;  %v256_v63 = vld [vmem:[%s1192_s1] sm:$0xff]  ;;  %v258_v4 = vld [vmem:[%s1192_s1 + $0x10] sm:$0xff] }
  0xd1   : > { %v240_v54 = vadd.f32 %v239_v46, %v976_v43  ;;  %v234_v55 = vadd.f32 %v233_v47, %v980_v45  ;;  %v998_v56 = vld [vmem:[#allocation2 + $0xf8] sm:$0xff]  ;;  %v292_v0 = vld [vmem:[%s1194_s3] sm:$0xff]  ;;  %v294_v9 = vld [vmem:[%s1194_s3 + $0x10] sm:$0xff] }
  0xd2   : > { %231 = vadd.xlane.f32.xlu0 %v230_v51  ;;  %v244_v57 = vadd.f32 %v243_v53, %v989_v50  ;;  %v643_v2 = vld [vmem:[%s1194_s3 + $0x20] sm:$0xff]  ;;  %v645_v10 = vld [vmem:[%s1194_s3 + $0x30] sm:$0xff]  ;;  %v257_v14 = vld [vmem:[%s1192_s1 + $0x8] sm:$0xff] }
  0xd3   : > { %241 = vadd.xlane.f32.xlu1 %v240_v54  ;;  %v235_v58 = vadd.f32 %v234_v55, %v992_v52  ;;  %v293_v15 = vld [vmem:[%s1194_s3 + $0x8] sm:$0xff]  ;;  %v259_v20 = vld [vmem:[%s1192_s1 + $0x18] sm:$0xff] }
  0xd4   : > { %v245_v59 = vadd.f32 %v244_v57, %v998_v56  ;;  %v644_v16 = vld [vmem:[%s1194_s3 + $0x28] sm:$0xff]  ;;  %v295_v21 = vld [vmem:[%s1194_s3 + $0x18] sm:$0xff] }
  0xd5   : > { %v646_v22 = vld [vmem:[%s1194_s3 + $0x38] sm:$0xff] }
  0xd6   : > { %236 = vadd.xlane.f32.xlu0 %v235_v58 }
  0xd7   : > { %246 = vadd.xlane.f32.xlu1 %v245_v59 }
 0x15f   : > { %v232_v60 = vpop.xlane.xlu0 %231 }
 0x160   : > { %v248_v61 = vadd.f32 %v232_v60, %v190_v29  ;;  %v242_v62 = vpop.xlane.xlu1 %241 }
 0x161   : > { %v250_v1 = vadd.f32 %v242_v62, %v200_v28 }
 0x162   : > { %v252_v3 = vmul.f32 0.0009765625, %v248_v61 }
 0x163   : > { %v254_v5 = vmul.f32 0.0009765625, %v250_v1  ;;  %v237_v6 = vpop.xlane.xlu0 %236 }
 0x164   : > { %v260_v7 = vmul.f32 %v256_v63, %v252_v3  ;;  %v296_v8 = vmul.f32 %v292_v0, %v252_v3  ;;  %v249_v11 = vadd.f32 %v237_v6, %v195_v31  ;;  %v247_v12 = vpop.xlane.xlu1 %246  ;;  %v365_v13 = vmul.f32 %v643_v2, %v252_v3 }
 0x165   : > { %v251_v17 = vadd.f32 %v247_v12, %v205_v30  ;;  %v262_v18 = vmul.f32 %v258_v4, %v254_v5  ;;  %v298_v24 = vmul.f32 %v294_v9, %v254_v5  ;;  %v367_v25 = vmul.f32 %v645_v10, %v254_v5 }
 0x166   : > { %v253_v19 = vmul.f32 0.0009765625, %v249_v11  ;;  %v265_v23 = vsel %vm264_vm0, %v260_v7, 0.0  ;;  %v300_v27 = vsel %vm264_vm0, %v296_v8, 0.0  ;;  %v369_v31 = vsel %vm264_vm0, %v365_v13, 0.0 }
 0x167   : > { %v255_v26 = vmul.f32 0.0009765625, %v251_v17  ;;  %v268_v46 = vsel %vm264_vm0, %v262_v18, 0.0  ;;  %v303_v54 = vsel %vm264_vm0, %v298_v24, 0.0  ;;  %v372_v59 = vsel %vm264_vm0, %v367_v25, 0.0  ;;  %v647_v24 = vld [vmem:[%s1195_s4 + $0x1] sm:$0x1] }
 0x168   : > { %v261_v28 = vmul.f32 %v257_v14, %v253_v19  ;;  %v297_v29 = vmul.f32 %v293_v15, %v253_v19  ;;  %v366_v30 = vmul.f32 %v644_v16, %v253_v19  ;;  %v320_v14 = vlaneseq }
 0x169   : > { %v263_v35 = vmul.f32 %v259_v20, %v255_v26  ;;  %v299_v40 = vmul.f32 %v295_v21, %v255_v26  ;;  %v368_v42 = vmul.f32 %v646_v22, %v255_v26  ;;  %v278_v22 = vld [vmem:[%s1193_s2] sm:$0x1] }
 0x16a   : > { %v266_v47 = vsel %vm264_vm0, %v261_v28, 0.0  ;;  %v301_v51 = vsel %vm264_vm0, %v297_v29, 0.0  ;;  %v370_v53 = vsel %vm264_vm0, %v366_v30, 0.0  ;;  %v321_v21 = vshrl.u32 %v320_v14, 7 }
 0x16b   : > { %v267_v55 = vadd.f32 %v266_v47, %v265_v23  ;;  %v302_v57 = vadd.f32 %v301_v51, %v300_v27  ;;  %v371_v58 = vadd.f32 %v370_v53, %v369_v31  ;;  %v270_v60 = vsel %vm264_vm0, %v263_v35, 0.0  ;;  %v313_v23 = vld [vmem:[%s1195_s4] sm:$0x1]  ;;  %v317_v47 = vld [vmem:[%s1196_s5 + $0x8] sm:$0xff] }
 0x16c   : > { %v305_v61 = vsel %vm264_vm0, %v299_v40, 0.0  ;;  %v374_v62 = vsel %vm264_vm0, %v368_v42, 0.0  ;;  %v322_v30 = vsub.s32 0, %v321_v21 }
 0x16d   : > { %v269_v63 = vadd.f32 %v268_v46, %v267_v55  ;;  %v304_v0 = vadd.f32 %v303_v54, %v302_v57  ;;  %v373_v1 = vadd.f32 %v372_v59, %v371_v58  ;;  %v316_v46 = vld [vmem:[%s1196_s5] sm:$0xff]  ;;  %v319_v54 = vld [vmem:[%s1196_s5 + $0x18] sm:$0xff]  ;;  %v649_v55 = vld [vmem:[%s1196_s5 + $0x28] sm:$0xff] }
 0x16e   : > { %v651_v57 = vld [vmem:[%s1196_s5 + $0x38] sm:$0xff]  ;;  %v318_v58 = vld [vmem:[%s1196_s5 + $0x10] sm:$0xff] }
 0x16f   : > { %v271_v2 = vadd.f32 %v270_v60, %v269_v63  ;;  %v306_v3 = vadd.f32 %v305_v61, %v304_v0  ;;  %v375_v4 = vadd.f32 %v374_v62, %v373_v1 }
 0x171   : > { %v307_v5 = vrot.slane %v306_v3, 4  ;;  %v376_v6 = vrot.slane %v375_v4, 4  ;;  %v272_v7 = vrot.slane %v271_v2, 4 }
 0x173   : > { %v308_v8 = vadd.f32 %v307_v5, %v306_v3  ;;  %v377_v9 = vadd.f32 %v376_v6, %v375_v4  ;;  %v273_v10 = vadd.f32 %v272_v7, %v271_v2  ;;  %v648_v2 = vld [vmem:[%s1196_s5 + $0x20] sm:$0xff] }
 0x175   : > { %v309_v11 = vrot.slane %v308_v8, 2  ;;  %v378_v12 = vrot.slane %v377_v9, 2  ;;  %v274_v13 = vrot.slane %v273_v10, 2 }
 0x177   : > { %v310_v15 = vadd.f32 %v309_v11, %v308_v8  ;;  %v379_v16 = vadd.f32 %v378_v12, %v377_v9  ;;  %v275_v17 = vadd.f32 %v274_v13, %v273_v10  ;;  %v650_v9 = vld [vmem:[%s1196_s5 + $0x30] sm:$0xff] }
 0x179   : > { %v311_v18 = vrot.slane %v310_v15, 1  ;;  %v380_v19 = vrot.slane %v379_v16, 1  ;;  %v276_v20 = vrot.slane %v275_v17, 1 }
 0x17b   : > { %v312_v25 = vadd.f32 %v311_v18, %v310_v15  ;;  %v381_v26 = vadd.f32 %v380_v19, %v379_v16  ;;  %v277_v27 = vadd.f32 %v276_v20, %v275_v17 }
 0x17d   : > { %v279_v28 = vadd.f32 %v278_v22, %v277_v27  ;;  %v314_v29 = vadd.f32 %v313_v23, %v312_v25  ;;  %v384_v31 = vadd.f32 %v647_v24, %v381_v26  ;;  %v828_v22 = vmov 0  }
 0x17e   : > { %687 = vset.pattern.permute.xlu0 %v828_v22  ;;  %686 = vset.pattern.permute.xlu1 %v828_v22 }
 0x17f   : > { %v281_v35 = vsel %vm280_vm1, %v279_v28, -inf  ;;  %v315_v40 = vmax.f32 %v314_v29, 0.0  ;;  %v385_v42 = vmax.f32 %v384_v31, 0.0  ;;  %v340_v29 = vld [vmem:[%s1197_s6] sm:$0xff]  ;;  %v342_v31 = vld [vmem:[%s1197_s6 + $0x10] sm:$0xff] }
 0x180   : > { %282 = vmax.xlane.f32.xlu0 %v281_v35  ;;  %v341_v35 = vld [vmem:[%s1197_s6 + $0x8] sm:$0xff] }
 0x181   : > { %v323_v51 = vrot.slane %v315_v40, %v322_v30  ;;  %v394_v53 = vrot.slane %v385_v42, %v322_v30  ;;  %v343_v40 = vld [vmem:[%s1197_s6 + $0x18] sm:$0xff]  ;;  %v654_v42 = vld [vmem:[%s1197_s6 + $0x30] sm:$0xff] }
 0x183   : > { %v324_v59 = vmul.f32 %v323_v51, %v316_v46  ;;  %v325_v60 = vmul.f32 %v323_v51, %v317_v47  ;;  %v327_v61 = vmul.f32 %v323_v51, %v319_v54  ;;  %v396_v62 = vmul.f32 %v649_v55, %v394_v53  ;;  %v653_v47 = vld [vmem:[%s1197_s6 + $0x28] sm:$0xff] }
 0x184   : > { %v398_v63 = vmul.f32 %v651_v57, %v394_v53  ;;  %v326_v1 = vmul.f32 %v323_v51, %v318_v58  ;;  %v395_v8 = vmul.f32 %v648_v2, %v394_v53  ;;  %v397_v11 = vmul.f32 %v650_v9, %v394_v53  ;;  %v655_v51 = vld [vmem:[%s1197_s6 + $0x38] sm:$0xff] }
 0x185   : > { %v328_v0 = vsel %vm264_vm0, %v324_v59, 0.0  ;;  %v331_v3 = vsel %vm264_vm0, %v325_v60, 0.0  ;;  %v337_v4 = vsel %vm264_vm0, %v327_v61, 0.0  ;;  %v402_v5 = vsel %vm264_vm0, %v396_v62, 0.0 }
 0x186   : > { %329 = vadd.xlane.f32.xlu0 %v328_v0  ;;  %v408_v6 = vsel %vm264_vm0, %v398_v63, 0.0  ;;  %v334_v7 = vsel %vm264_vm0, %v326_v1, 0.0  ;;  %v399_v10 = vsel %vm264_vm0, %v395_v8, 0.0  ;;  %v405_v12 = vsel %vm264_vm0, %v397_v11, 0.0 }
 0x18a   : > { %335 = vadd.xlane.f32.xlu0 %v334_v7 }
 0x18e   : > { %400 = vadd.xlane.f32.xlu0 %v399_v10 }
 0x192   : > { %406 = vadd.xlane.f32.xlu0 %v405_v12 }
 0x20d   : > { %v283_v13 = vpop.xlane.xlu0 %282 }
 0x20e   : > { %v284_v14 = vsub.f32 %v279_v28, %v283_v13 }
 0x210   : > { %v285_v15 = vmul.f32 1.442695, %v284_v14 }
 0x212   : > { %688 = vpow2.f32 %v285_v15 }
 0x213   : > { %v330_v23 = vpop.xlane.xlu0 %329 }
 0x214   : > { %v344_v54 = vadd.f32 %v340_v29, %v330_v23  ;;  %v457_v29 = vld [vmem:[#allocation2 + $0x8] sm:$0xff] }
 0x217   : > { %v336_v25 = vpop.xlane.xlu0 %335 }
 0x218   : > { %v346_v55 = vadd.f32 %v342_v31, %v336_v25  ;;  %v458_v31 = vld [vmem:[#allocation2 + $0x10] sm:$0xff] }
 0x21b   : > { %v401_v27 = vpop.xlane.xlu0 %400 }
 0x21c   : > { %v689_v16 = vpop.eup %688 }
 0x21d   : > { %v287_v17 = vsel %vm280_vm1, %v689_v16, 0.0 }
 0x21e   : > { %288 = vadd.xlane.f32.xlu1 %v287_v17 }
 0x21f   : > { %v407_v46 = vpop.xlane.xlu0 %406 }
 0x220   : > { %v418_v60 = vadd.f32 %v654_v42, %v407_v46  ;;  %v469_v42 = vld [vmem:[#allocation2 + $0x68] sm:$0xff]  ;;  %v470_v46 = vld [vmem:[#allocation2 + $0x70] sm:$0xff] }
 0x222   : > { %332 = vadd.xlane.f32.xlu1 %v331_v3 }
 0x226   : > { %338 = vadd.xlane.f32.xlu1 %v337_v4 }
 0x22a   : > { %403 = vadd.xlane.f32.xlu1 %v402_v5 }
 0x22e   : > { %409 = vadd.xlane.f32.xlu1 %v408_v6 }
 0x2ab   : > { %v289_v18 = vpop.xlane.xlu1 %288 }
 0x2ac   : > { %690 = vrcp.f32 %v289_v18 }
 0x2af   : > { %v333_v24 = vpop.xlane.xlu1 %332 }
 0x2b0   : > { %v345_v57 = vadd.f32 %v341_v35, %v333_v24  ;;  %v468_v35 = vld [vmem:[#allocation2 + $0x60] sm:$0xff] }
 0x2b3   : > { %v339_v26 = vpop.xlane.xlu1 %338 }
 0x2b4   : > { %v347_v58 = vadd.f32 %v343_v40, %v339_v26 }
 0x2b6   : > { %v691_v19 = vpop.eup %690 }
 0x2b7   : > { %v291_v20 = vmul.f32 %v691_v19, %v689_v16  ;;  %v404_v28 = vpop.xlane.xlu1 %403 }
 0x2b8   : > { %v417_v61 = vadd.f32 %v653_v47, %v404_v28  ;;  %v456_v28 = vld [vmem:[#allocation2] sm:$0xff]  ;;  %v471_v47 = vld [vmem:[#allocation2 + $0x78] sm:$0xff] }
 0x2b9   : > { %v351_v21 = vrot.slane %v291_v20, %v322_v30  ;;  %v652_v30 = vld [vmem:[%s1197_s6 + $0x20] sm:$0xff] }
 0x2ba   : > { %v416_v59 = vadd.f32 %v652_v30, %v401_v27  ;;  %v459_v30 = vld [vmem:[#allocation2 + $0x18] sm:$0xff] }
 0x2bb   : > { %421 = vrot.lane.b32.xlu0 %v351_v21, %s827_s30  ;;  %v410_v53 = vpop.xlane.xlu1 %409  ;;  %v353_v63 = vmul.f32 %v351_v21, %v345_v57  ;;  %v355_v0 = vmul.f32 %v351_v21, %v347_v58  ;;  %v352_v1 = vmul.f32 %v351_v21, %v344_v54  ;;  %v354_v2 = vmul.f32 %v351_v21, %v346_v55  ;;  %v460_v57 = vld [vmem:[#allocation2 + $0x20] sm:$0xff] }
 0x2bc   : > { %v419_v62 = vadd.f32 %v655_v51, %v410_v53 }
 0x32d   : > { %v422_v3 = vpop.permute.xlu0 %421 }
 0x32e   : > { %v424_v4 = vmul.f32 %v422_v3, %v416_v59  ;;  %v425_v5 = vmul.f32 %v422_v3, %v417_v61  ;;  %v426_v6 = vmul.f32 %v422_v3, %v418_v60  ;;  %v427_v7 = vmul.f32 %v422_v3, %v419_v62  ;;  %v461_v59 = vld [vmem:[#allocation2 + $0x28] sm:$0xff]  ;;  %v462_v60 = vld [vmem:[#allocation2 + $0x30] sm:$0xff]  ;;  %v463_v61 = vld [vmem:[#allocation2 + $0x38] sm:$0xff] }
 0x32f   : > { %v464_v3 = vld [vmem:[#allocation2 + $0x40] sm:$0xff] }
 0x330   : > { %v428_v8 = vadd.f32 %v424_v4, %v352_v1  ;;  %v429_v9 = vadd.f32 %v425_v5, %v353_v63  ;;  %v430_v10 = vadd.f32 %v426_v6, %v354_v2  ;;  %v431_v11 = vadd.f32 %v427_v7, %v355_v0 }
 0x332   : > { %v656_v12 = vmul.f32 -1.442695, %v428_v8  ;;  %v657_v13 = vmul.f32 -1.442695, %v429_v9  ;;  %v659_v14 = vmul.f32 -1.442695, %v431_v11 }
 0x333   : > { %v658_v15 = vmul.f32 -1.442695, %v430_v10  ;;  %v465_v8 = vld [vmem:[#allocation2 + $0x48] sm:$0xff]  ;;  %v466_v9 = vld [vmem:[#allocation2 + $0x50] sm:$0xff]  ;;  %v467_v10 = vld [vmem:[#allocation2 + $0x58] sm:$0xff] }
 0x334   : > { %692 = vpow2.f32 %v656_v12 }
 0x335   : > { %694 = vpow2.f32 %v657_v13 }
 0x336   : > { %696 = vpow2.f32 %v659_v14 }
 0x337   : > { %698 = vpow2.f32 %v658_v15 }
 0x33e   : > { %v693_v16 = vpop.eup %692 }
 0x33f   : > { %v695_v17 = vpop.eup %694  ;;  %v444_v18 = vadd.f32 1.0, %v693_v16 }
 0x340   : > { %v697_v19 = vpop.eup %696  ;;  %v445_v20 = vadd.f32 1.0, %v695_v17 }
 0x341   : > { %700 = vrcp.f32 %v444_v18  ;;  %v699_v21 = vpop.eup %698  ;;  %v447_v22 = vadd.f32 1.0, %v697_v19 }
 0x342   : > { %v446_v23 = vadd.f32 1.0, %v699_v21 }
 0x343   : > { %702 = vrcp.f32 %v447_v22 }
 0x344   : > { %704 = vrcp.f32 %v445_v20 }
 0x345   : > { %706 = vrcp.f32 %v446_v23 }
 0x34b   : > { %v701_v24 = vpop.eup %700 }
 0x34c   : > { %474 = vperm.xlu1 %686, %v701_v24  }
 0x34d   : > { %v703_v25 = vpop.eup %702 }
 0x34e   : > { %v705_v26 = vpop.eup %704  ;;  %489 = vperm.xlu0 %687, %v703_v25  }
 0x34f   : > { %v707_v27 = vpop.eup %706 }
 0x350   : > { %479 = vperm.xlu1 %686, %v705_v26  }
 0x354   : > { %484 = vperm.xlu1 %686, %v707_v27  }
 0x3cb   : > { %v475_v40 = vpop.permute.xlu1 %474 }
 0x3cc   : > { %v492_v51 = vmul.f32 %v475_v40, %v456_v28  ;;  %v493_v53 = vmul.f32 %v475_v40, %v457_v29  ;;  %v494_v54 = vmul.f32 %v475_v40, %v458_v31  ;;  %v495_v55 = vmul.f32 %v475_v40, %v459_v30 }
 0x3cd   : > { %v490_v58 = vpop.permute.xlu0 %489  ;;  %v547_v11 = vmul.f32 %v475_v40, %v955_v32  ;;  %v548_v12 = vmul.f32 %v475_v40, %v957_v33  ;;  %v549_v13 = vmul.f32 %v475_v40, %v959_v34  ;;  %v550_v14 = vmul.f32 %v475_v40, %v967_v38 }
 0x3ce   : > { %508 = vst [vmem:[#allocation2] sm:$0xff] %v492_v51  ;;  %509 = vst [vmem:[#allocation2 + $0x8] sm:$0xff] %v493_v53  ;;  %v504_v62 = vmul.f32 %v490_v58, %v468_v35  ;;  %v505_v63 = vmul.f32 %v490_v58, %v469_v42  ;;  %v506_v0 = vmul.f32 %v490_v58, %v470_v46 }
 0x3cf   : > { %510 = vst [vmem:[#allocation2 + $0x10] sm:$0xff] %v494_v54  ;;  %511 = vst [vmem:[#allocation2 + $0x18] sm:$0xff] %v495_v55  ;;  %v507_v1 = vmul.f32 %v490_v58, %v471_v47  ;;  %v480_v2 = vpop.permute.xlu1 %479  ;;  %v559_v15 = vmul.f32 %v490_v58, %v985_v48  ;;  %v560_v16 = vmul.f32 %v490_v58, %v987_v49 }
 0x3d0   : > { %520 = vst [vmem:[#allocation2 + $0x60] sm:$0xff] %v504_v62  ;;  %521 = vst [vmem:[#allocation2 + $0x68] sm:$0xff] %v505_v63  ;;  %v496_v4 = vmul.f32 %v480_v2, %v460_v57  ;;  %v497_v5 = vmul.f32 %v480_v2, %v461_v59  ;;  %v498_v6 = vmul.f32 %v480_v2, %v462_v60 }
 0x3d1   : > { %522 = vst [vmem:[#allocation2 + $0x70] sm:$0xff] %v506_v0  ;;  %523 = vst [vmem:[#allocation2 + $0x78] sm:$0xff] %v507_v1  ;;  %v499_v7 = vmul.f32 %v480_v2, %v463_v61  ;;  %v561_v17 = vmul.f32 %v490_v58, %v989_v50  ;;  %v562_v18 = vmul.f32 %v490_v58, %v998_v56 }
 0x3d2   : > { %512 = vst [vmem:[#allocation2 + $0x20] sm:$0xff] %v496_v4  ;;  %513 = vst [vmem:[#allocation2 + $0x28] sm:$0xff] %v497_v5  ;;  %v551_v48 = vmul.f32 %v480_v2, %v973_v41  ;;  %v552_v49 = vmul.f32 %v480_v2, %v978_v44  ;;  %v553_v50 = vmul.f32 %v480_v2, %v980_v45 }
 0x3d3   : > { %514 = vst [vmem:[#allocation2 + $0x30] sm:$0xff] %v498_v6  ;;  %515 = vst [vmem:[#allocation2 + $0x38] sm:$0xff] %v499_v7  ;;  %v485_v19 = vpop.permute.xlu1 %484  ;;  %v554_v56 = vmul.f32 %v480_v2, %v992_v52 }
 0x3d4   : > { %v500_v32 = vmul.f32 %v485_v19, %v464_v3  ;;  %v501_v33 = vmul.f32 %v485_v19, %v465_v8  ;;  %v502_v34 = vmul.f32 %v485_v19, %v466_v9  ;;  %v503_v38 = vmul.f32 %v485_v19, %v467_v10 }
 0x3d5   : > { %v555_v20 = vmul.f32 %v485_v19, %v963_v36  ;;  %v556_v21 = vmul.f32 %v485_v19, %v965_v37  ;;  %v557_v22 = vmul.f32 %v485_v19, %v969_v39  ;;  %v558_v23 = vmul.f32 %v485_v19, %v976_v43 }
 0x3d6   : > { %516 = vst [vmem:[#allocation2 + $0x40] sm:$0xff] %v500_v32  ;;  %517 = vst [vmem:[#allocation2 + $0x48] sm:$0xff] %v501_v33 }
 0x3d7   : > { %518 = vst [vmem:[#allocation2 + $0x50] sm:$0xff] %v502_v34  ;;  %519 = vst [vmem:[#allocation2 + $0x58] sm:$0xff] %v503_v38 }
 0x3d8   : > { %768 = shalt.err (!%p728_p12)  }
 0x3d9   : > { %s769_s22 = scalar_lea.hbm %s1130_s17, 2048  ;;  %s771_s28 = scalar_lea.hbm %s1198_s7, 8192 }
 0x3da   : > { %p770_p0 = scmp.ne.s32.totalorder %s1130_s17, %s769_s22  ;;  %p772_p1 = scmp.lt.u32.totalorder %s1130_s17, %s1198_s7 }
 0x3db   : > { %p773_p8 = scmp.lt.u32.totalorder %s771_s28, %s769_s22  ;;  %p775_p12 = scmp.lt.u32.totalorder %s769_s22, %s1130_s17 }
 0x3dd   : > { %p774_p11 = por %p773_p8, %p772_p1 }
 0x3df   : > { %p776_p2 = por %p775_p12, %p774_p11 }
 0x3e1   : > { %p777_p3 = pnand %p776_p2, %p770_p0 }
 0x3e3   : > { %780 = shalt.err (!%p777_p3)  }
 0x3e4   : > { %530 = dma.vmem_to_hbm [thread:$0]  %s884_s8, 2048, %s1130_s17, [#allocation4], %s824_s20, %s823_s19, %s825_s21 }
 0x3e5   : > { %563 = vst [vmem:[#allocation2 + $0x80] sm:$0xff] %v547_v11  ;;  %564 = vst [vmem:[#allocation2 + $0x88] sm:$0xff] %v548_v12 }
 0x3e6   : > { %565 = vst [vmem:[#allocation2 + $0x90] sm:$0xff] %v549_v13  ;;  %566 = vst [vmem:[#allocation2 + $0x98] sm:$0xff] %v550_v14 }
 0x3e7   : > { %567 = vst [vmem:[#allocation2 + $0xa0] sm:$0xff] %v551_v48  ;;  %568 = vst [vmem:[#allocation2 + $0xa8] sm:$0xff] %v552_v49 }
 0x3e8   : > { %569 = vst [vmem:[#allocation2 + $0xb0] sm:$0xff] %v553_v50  ;;  %570 = vst [vmem:[#allocation2 + $0xb8] sm:$0xff] %v554_v56 }
 0x3e9   : > { %571 = vst [vmem:[#allocation2 + $0xc0] sm:$0xff] %v555_v20  ;;  %572 = vst [vmem:[#allocation2 + $0xc8] sm:$0xff] %v556_v21 }
 0x3ea   : > { %573 = vst [vmem:[#allocation2 + $0xd0] sm:$0xff] %v557_v22  ;;  %574 = vst [vmem:[#allocation2 + $0xd8] sm:$0xff] %v558_v23 }
 0x3eb   : > { %575 = vst [vmem:[#allocation2 + $0xe0] sm:$0xff] %v559_v15  ;;  %576 = vst [vmem:[#allocation2 + $0xe8] sm:$0xff] %v560_v16 }
 0x3ec   : > { %577 = vst [vmem:[#allocation2 + $0xf0] sm:$0xff] %v561_v17  ;;  %578 = vst [vmem:[#allocation2 + $0xf8] sm:$0xff] %v562_v18 }
 0x3ed   : > { %792 = shalt.err (!%p752_p13)  }
 0x3ee   : > { %s805_s8 = scalar_lea.hbm %s1130_s17, 2560  ;;  %p796_p5 = scmp.lt.u32.totalorder %s1141_s26, %s1198_s7 }
 0x3ef   : > { %p794_p4 = scmp.ne.s32.totalorder %s1141_s26, %s805_s8  ;;  %p797_p7 = scmp.lt.u32.totalorder %s771_s28, %s805_s8 }
 0x3f0   : > { %p799_p0 = scmp.lt.u32.totalorder %s805_s8, %s1141_s26 }
 0x3f1   : > { %p798_p9 = por %p797_p7, %p796_p5 }
 0x3f3   : > { %p800_p1 = por %p799_p0, %p798_p9 }
 0x3f5   : > { %p801_p6 = pnand %p800_p1, %p794_p4 }
 0x3f7   : > { %804 = shalt.err (!%p801_p6)  }
 0x3f8   : > { %586 = dma.vmem_to_hbm [thread:$0]  %s924_s25, 2048, %s1141_s26, [#allocation4 + $0x1], %s824_s20, %s823_s19, %s825_s21 }
 0x3f9   : > { %814 = dma.done.wait [#allocation4], 2048 }
 0x3fa   : > { %815 = vsyncadd [#allocation4], 4294965248 }
 0x3fb   : > { %816 = dma.done.wait [#allocation4 + $0x1], 2048 }
 0x3fc   : > { %817 = vsyncadd [#allocation4 + $0x1], 4294965248 }
 0x3fd PF: > { %s17_s24 = sadd.s32 1, %s820_s24  }
 0x3fe   : > { %p14_p10 = scmp.ge.s32.totalorder %s17_s24, 3  }
 0x400   :  { %16 = sbr.rel (!%p14_p10) target bundleno = 1 (0x1), region = 68 }
 0x407   :  { %591 = vsyncmov [#allocation3] }
 0x40a   :  { %s592_s10 = vpop.sfrf %591 }
 0x40b   :  { %p663_p13 = scmp.ne.s32.totalorder %s592_s10, 0 }
 0x40d   :  { %596 = shalt.err (%p663_p13)  }
 0x40e   :  { %598 = vsyncmov [#allocation3 + $0x1] }
 0x411   :  { %s599_s29 = vpop.sfrf %598 }
 0x412   :  { %p664_p8 = scmp.ne.s32.totalorder %s599_s29, 0 }
 0x414   :  { %603 = shalt.err (%p664_p8)  }
 0x415   :  { %604 = vsyncmov [#allocation4] }
 0x418   :  { %s605_s19 = vpop.sfrf %604 }
 0x419   :  { %p665_p11 = scmp.ne.s32.totalorder %s605_s19, 0 }
 0x41b   :  { %609 = shalt.err (%p665_p11)  }
 0x41c   :  { %611 = vsyncmov [#allocation4 + $0x1] }
 0x41f   :  { %s612_s20 = vpop.sfrf %611 }
 0x420   :  { %p666_p12 = scmp.ne.s32.totalorder %s612_s20, 0 }
 0x422   :  { %616 = shalt.err (%p666_p12)  }

</bundles_post_ra>
